<compile_context>
chip_gen: v6e
topology: v6e:2x2x1
jax: 0.10.0
libtpu: 0.0.40
codegen_flags: <defaults>
</compile_context>

<pallas_src>
import functools

import numpy as np
import jax
import jax.numpy as jnp
from jax.experimental import pallas as pl
from jax.experimental.pallas import tpu as pltpu


# ---------------------------------------------------------------------------
# Constant interpolation matrices (PyTorch F.interpolate, align_corners=False)
# ---------------------------------------------------------------------------
def _bilinear_matrix_np(in_size: int, out_size: int) -> np.ndarray:
    """Row matrix A (out_size, in_size) with A @ v == bilinear-resized v."""
    scale = in_size / out_size
    i = np.arange(out_size)
    src = (i + 0.5) * scale - 0.5
    src = np.maximum(src, 0.0)                        # PyTorch clamps negatives
    i0 = np.minimum(np.floor(src).astype(np.int64), in_size - 1)
    i1 = np.minimum(i0 + 1, in_size - 1)
    w1 = src - i0
    w0 = 1.0 - w1
    a = np.zeros((out_size, in_size), dtype=np.float32)
    a[i, i0] += w0.astype(np.float32)
    a[i, i1] += w1.astype(np.float32)                 # i0==i1 at edges -> sums to 1
    return a


# ---------------------------------------------------------------------------
# Pallas kernel
# ---------------------------------------------------------------------------
def _up2_kernel(x_ref, ah_ref, awt_ref, o_ref, *, bc):
    # x_ref  : (bc, H,  W)    input channel block (caller dtype)
    # ah_ref : (th2, H)       output-row interpolation tile (f32)
    # awt_ref: (W, 2W)        column interpolation matrix, transposed (f32)
    # o_ref  : (bc, th2, 2W)  output tile, natural layout
    ah = ah_ref[...]                                  # hoisted out of the loop
    awt = awt_ref[...]
    for c in range(bc):                               # static unroll, bc small
        xc = x_ref[c].astype(jnp.float32)
        t = jnp.dot(ah, xc, preferred_element_type=jnp.float32)       # (th2, W)
        o_ref[c] = jnp.dot(t, awt,
                           preferred_element_type=jnp.float32).astype(o_ref.dtype)


# ---------------------------------------------------------------------------
# Tiling heuristics
# ---------------------------------------------------------------------------
def _pick_row_tile(h2: int, cap: int = 512) -> int:
    """Output-row tile: full H2 if small, else the largest aligned divisor of
    H2 that is <= cap (keeps blocks inside the scoped-VMEM budget)."""
    if h2 <= cap:
        return h2
    for align in (32, 16, 8):                         # 32 keeps bf16/int8 safe
        start = cap - (cap % align)
        for t in range(start, align - 1, -align):
            if h2 % t == 0:
                return t
    return h2                                         # no aligned divisor: full


def _pick_channel_block(nc: int, bytes_per_channel: int,
                        cap_bytes: int = 8 << 20) -> int:
    bc = 1
    for d in (32, 16, 8, 4, 2, 1):
        if nc % d == 0 and d * bytes_per_channel <= cap_bytes:
            bc = d
            break
    # Keep >= 2 grid steps on the channel axis when possible so the two v7x
    # TensorCores / the DMA pipeline have something to overlap.
    while bc > 1 and nc // bc < 2:
        bc //= 2
    return bc


# ---------------------------------------------------------------------------
# Forward wrapper
# ---------------------------------------------------------------------------
def up2_forward(x_nchw):
    """F.interpolate(x, size=(2H, 2W), mode='bilinear') for NCHW input."""
    N, C, H, W = x_nchw.shape
    H2, W2 = 2 * H, 2 * W
    nc = N * C

    a_h = jnp.asarray(_bilinear_matrix_np(H, H2))            # (H2, H)
    a_wt = jnp.asarray(_bilinear_matrix_np(W, W2).T.copy())  # (W, W2)

    th2 = _pick_row_tile(H2)
    bytes_per_channel = 4 * (H * W + th2 * W2)                # f32-conservative
    bc = _pick_channel_block(nc, bytes_per_channel)

    x_flat = x_nchw.reshape(nc, H, W)                         # contiguous, free

    out = pl.pallas_call(
        functools.partial(_up2_kernel, bc=bc),
        out_shape=jax.ShapeDtypeStruct((nc, H2, W2), x_nchw.dtype),
        grid=(nc // bc, H2 // th2),                           # row tiles innermost
        in_specs=[
            pl.BlockSpec((bc, H, W), lambda i, j: (i, 0, 0)),  # fetched once per i
            pl.BlockSpec((th2, H), lambda i, j: (j, 0)),       # small row tile
            pl.BlockSpec((W, W2), lambda i, j: (0, 0)),        # fetched once
        ],
        out_specs=pl.BlockSpec((bc, th2, W2), lambda i, j: (i, j, 0)),
        compiler_params=pltpu.CompilerParams(
            dimension_semantics=("parallel", "parallel"),
            vmem_limit_bytes=48 * 1024 * 1024,
        ),
    )(x_flat, a_h, a_wt)

    return out.reshape(N, C, H2, W2)


# ---------------------------------------------------------------------------
# Independent (gather-based) reference of the same PyTorch semantics
# ---------------------------------------------------------------------------
def _reference_up2(x_np):
    N, C, H, W = x_np.shape

    def axis_weights(in_size, out_size):
        src = (np.arange(out_size) + 0.5) * (in_size / out_size) - 0.5
        src = np.maximum(src, 0.0)
        i0 = np.minimum(np.floor(src).astype(np.int64), in_size - 1)
        i1 = np.minimum(i0 + 1, in_size - 1)
        w1 = (src - i0).astype(np.float32)
        return i0, i1, w1

    h0, h1, wh = axis_weights(H, 2 * H)
    w0, w1, ww = axis_weights(W, 2 * W)
    xv = np.asarray(x_np, dtype=np.float32)
    rows = (xv[:, :, h0, :] * (1.0 - wh)[None, None, :, None]
            + xv[:, :, h1, :] * wh[None, None, :, None])
    out = rows[:, :, :, w0] * (1.0 - ww) + rows[:, :, :, w1] * ww
    return out


if __name__ == "__main__":
    key = jax.random.PRNGKey(0)

    # Primary test shape.
    N, C, H, W = 2, 4, 16, 16
    x = jax.random.normal(key, (N, C, H, W), jnp.float32)
    out = jax.block_until_ready(up2_forward(x))
    assert out.shape == (N, C, 2 * H, 2 * W), out.shape
    assert out.dtype == x.dtype
    assert bool(jnp.all(jnp.isfinite(out)))
    ref = _reference_up2(np.asarray(x))
    max_err = float(jnp.max(jnp.abs(out.astype(jnp.float32) - jnp.asarray(ref))))
    assert max_err < 1e-4, f"max |err| vs reference = {max_err}"

    # Odd, non-aligned spatial dims (exercises bc=1 / full-block path).
    x2 = jax.random.normal(jax.random.PRNGKey(0), (1, 3, 10, 12), jnp.float32)
    out2 = jax.block_until_ready(up2_forward(x2))
    ref2 = _reference_up2(np.asarray(x2))
    max_err2 = float(jnp.max(jnp.abs(out2.astype(jnp.float32) - jnp.asarray(ref2))))
    assert out2.shape == (1, 3, 20, 24), out2.shape
    assert max_err2 < 1e-4, f"max |err| vs reference (odd dims) = {max_err2}"

    print("KERNEL_OK")
</pallas_src>

<mosaic_0001>
module attributes {stable_mosaic.version = 11 : i64} {
  func.func @_up2_kernel(%arg0: i32, %arg1: i32, %arg2: memref<4x16x16xf32, #tpu.memory_space<vmem>>, %arg3: memref<32x16xf32, #tpu.memory_space<vmem>>, %arg4: memref<16x32xf32, #tpu.memory_space<vmem>>, %arg5: memref<4x32x32xf32, #tpu.memory_space<vmem>>) attributes {dimension_semantics = [#tpu.dimension_semantics<parallel>, #tpu.dimension_semantics<parallel>], iteration_bounds = array<i64: 2, 1>, scalar_prefetch = 0 : i64, scratch_operands = 0 : i64, tpu.core_type = #tpu.core_type<tc>, window_params = [{transform_indices = @transform_0, window_bounds = array<i64: 4, 16, 16>}, {transform_indices = @transform_1, window_bounds = array<i64: 32, 16>}, {pipeline_mode = #tpu.pipeline_mode<synchronous>, transform_indices = @transform_2, window_bounds = array<i64: 16, 32>}, {transform_indices = @transform_3, window_bounds = array<i64: 4, 32, 32>}]} {
    %c0 = arith.constant 0 : index
    %c0_0 = arith.constant 0 : index
    %0 = vector.load %arg3[%c0, %c0_0] : memref<32x16xf32, #tpu.memory_space<vmem>>, vector<32x16xf32>
    %c0_1 = arith.constant 0 : index
    %c0_2 = arith.constant 0 : index
    %1 = vector.load %arg4[%c0_1, %c0_2] : memref<16x32xf32, #tpu.memory_space<vmem>>, vector<16x32xf32>
    %c0_3 = arith.constant 0 : index
    %c0_4 = arith.constant 0 : index
    %c0_5 = arith.constant 0 : index
    %2 = vector.load %arg2[%c0_3, %c0_4, %c0_5] : memref<4x16x16xf32, #tpu.memory_space<vmem>>, vector<1x16x16xf32>
    %3 = vector.shape_cast %2 : vector<1x16x16xf32> to vector<16x16xf32>
    %cst = arith.constant dense<0.000000e+00> : vector<32x16xf32>
    %4 = tpu.matmul %0, %3, %cst {dimension_numbers = #tpu.dot_dimension_numbers<[1], [0], [0], [1], [0, 0, 1, 1], [], []>} : vector<32x16xf32>, vector<16x16xf32>, vector<32x16xf32> -> vector<32x16xf32>
    %cst_6 = arith.constant dense<0.000000e+00> : vector<32x32xf32>
    %5 = tpu.matmul %4, %1, %cst_6 {dimension_numbers = #tpu.dot_dimension_numbers<[1], [0], [0], [1], [0, 0, 1, 1], [], []>} : vector<32x16xf32>, vector<16x32xf32>, vector<32x32xf32> -> vector<32x32xf32>
    %c0_7 = arith.constant 0 : index
    %c0_8 = arith.constant 0 : index
    %c0_9 = arith.constant 0 : index
    %6 = vector.load %arg5[%c0_7, %c0_8, %c0_9] : memref<4x32x32xf32, #tpu.memory_space<vmem>>, vector<1x32x32xf32>
    %7 = vector.shape_cast %6 : vector<1x32x32xf32> to vector<32x32xf32>
    %8 = vector.shape_cast %5 : vector<32x32xf32> to vector<1x32x32xf32>
    tpu.vector_store %arg5[%c0_7, %c0_8, %c0_9], %8 {strides = array<i32>} : memref<4x32x32xf32, #tpu.memory_space<vmem>>, vector<1x32x32xf32>,
    %c1 = arith.constant 1 : index
    %c0_10 = arith.constant 0 : index
    %c0_11 = arith.constant 0 : index
    %9 = vector.load %arg2[%c1, %c0_10, %c0_11] : memref<4x16x16xf32, #tpu.memory_space<vmem>>, vector<1x16x16xf32>
    %10 = vector.shape_cast %9 : vector<1x16x16xf32> to vector<16x16xf32>
    %cst_12 = arith.constant dense<0.000000e+00> : vector<32x16xf32>
    %11 = tpu.matmul %0, %10, %cst_12 {dimension_numbers = #tpu.dot_dimension_numbers<[1], [0], [0], [1], [0, 0, 1, 1], [], []>} : vector<32x16xf32>, vector<16x16xf32>, vector<32x16xf32> -> vector<32x16xf32>
    %cst_13 = arith.constant dense<0.000000e+00> : vector<32x32xf32>
    %12 = tpu.matmul %11, %1, %cst_13 {dimension_numbers = #tpu.dot_dimension_numbers<[1], [0], [0], [1], [0, 0, 1, 1], [], []>} : vector<32x16xf32>, vector<16x32xf32>, vector<32x32xf32> -> vector<32x32xf32>
    %c1_14 = arith.constant 1 : index
    %c0_15 = arith.constant 0 : index
    %c0_16 = arith.constant 0 : index
    %13 = vector.load %arg5[%c1_14, %c0_15, %c0_16] : memref<4x32x32xf32, #tpu.memory_space<vmem>>, vector<1x32x32xf32>
    %14 = vector.shape_cast %13 : vector<1x32x32xf32> to vector<32x32xf32>
    %15 = vector.shape_cast %12 : vector<32x32xf32> to vector<1x32x32xf32>
    tpu.vector_store %arg5[%c1_14, %c0_15, %c0_16], %15 {strides = array<i32>} : memref<4x32x32xf32, #tpu.memory_space<vmem>>, vector<1x32x32xf32>,
    %c2 = arith.constant 2 : index
    %c0_17 = arith.constant 0 : index
    %c0_18 = arith.constant 0 : index
    %16 = vector.load %arg2[%c2, %c0_17, %c0_18] : memref<4x16x16xf32, #tpu.memory_space<vmem>>, vector<1x16x16xf32>
    %17 = vector.shape_cast %16 : vector<1x16x16xf32> to vector<16x16xf32>
    %cst_19 = arith.constant dense<0.000000e+00> : vector<32x16xf32>
    %18 = tpu.matmul %0, %17, %cst_19 {dimension_numbers = #tpu.dot_dimension_numbers<[1], [0], [0], [1], [0, 0, 1, 1], [], []>} : vector<32x16xf32>, vector<16x16xf32>, vector<32x16xf32> -> vector<32x16xf32>
    %cst_20 = arith.constant dense<0.000000e+00> : vector<32x32xf32>
    %19 = tpu.matmul %18, %1, %cst_20 {dimension_numbers = #tpu.dot_dimension_numbers<[1], [0], [0], [1], [0, 0, 1, 1], [], []>} : vector<32x16xf32>, vector<16x32xf32>, vector<32x32xf32> -> vector<32x32xf32>
    %c2_21 = arith.constant 2 : index
    %c0_22 = arith.constant 0 : index
    %c0_23 = arith.constant 0 : index
    %20 = vector.load %arg5[%c2_21, %c0_22, %c0_23] : memref<4x32x32xf32, #tpu.memory_space<vmem>>, vector<1x32x32xf32>
    %21 = vector.shape_cast %20 : vector<1x32x32xf32> to vector<32x32xf32>
    %22 = vector.shape_cast %19 : vector<32x32xf32> to vector<1x32x32xf32>
    tpu.vector_store %arg5[%c2_21, %c0_22, %c0_23], %22 {strides = array<i32>} : memref<4x32x32xf32, #tpu.memory_space<vmem>>, vector<1x32x32xf32>,
    %c3 = arith.constant 3 : index
    %c0_24 = arith.constant 0 : index
    %c0_25 = arith.constant 0 : index
    %23 = vector.load %arg2[%c3, %c0_24, %c0_25] : memref<4x16x16xf32, #tpu.memory_space<vmem>>, vector<1x16x16xf32>
    %24 = vector.shape_cast %23 : vector<1x16x16xf32> to vector<16x16xf32>
    %cst_26 = arith.constant dense<0.000000e+00> : vector<32x16xf32>
    %25 = tpu.matmul %0, %24, %cst_26 {dimension_numbers = #tpu.dot_dimension_numbers<[1], [0], [0], [1], [0, 0, 1, 1], [], []>} : vector<32x16xf32>, vector<16x16xf32>, vector<32x16xf32> -> vector<32x16xf32>
    %cst_27 = arith.constant dense<0.000000e+00> : vector<32x32xf32>
    %26 = tpu.matmul %25, %1, %cst_27 {dimension_numbers = #tpu.dot_dimension_numbers<[1], [0], [0], [1], [0, 0, 1, 1], [], []>} : vector<32x16xf32>, vector<16x32xf32>, vector<32x32xf32> -> vector<32x32xf32>
    %c3_28 = arith.constant 3 : index
    %c0_29 = arith.constant 0 : index
    %c0_30 = arith.constant 0 : index
    %27 = vector.load %arg5[%c3_28, %c0_29, %c0_30] : memref<4x32x32xf32, #tpu.memory_space<vmem>>, vector<1x32x32xf32>
    %28 = vector.shape_cast %27 : vector<1x32x32xf32> to vector<32x32xf32>
    %29 = vector.shape_cast %26 : vector<32x32xf32> to vector<1x32x32xf32>
    tpu.vector_store %arg5[%c3_28, %c0_29, %c0_30], %29 {strides = array<i32>} : memref<4x32x32xf32, #tpu.memory_space<vmem>>, vector<1x32x32xf32>,
    return
  }
  func.func @transform_0(%arg0: i32, %arg1: i32) -> (i32, i32, i32) {
    %c0_i32 = arith.constant 0 : i32
    %c0_i32_0 = arith.constant 0 : i32
    %c0_i32_1 = arith.constant 0 : i32
    return %arg0, %c0_i32, %c0_i32_0 : i32, i32, i32
  }
  func.func @transform_1(%arg0: i32, %arg1: i32) -> (i32, i32) {
    %c0_i32 = arith.constant 0 : i32
    %c0_i32_0 = arith.constant 0 : i32
    return %arg1, %c0_i32 : i32, i32
  }
  func.func @transform_2(%arg0: i32, %arg1: i32) -> (i32, i32) {
    %c0_i32 = arith.constant 0 : i32
    %c0_i32_0 = arith.constant 0 : i32
    %c0_i32_1 = arith.constant 0 : i32
    return %c0_i32, %c0_i32_0 : i32, i32
  }
  func.func @transform_3(%arg0: i32, %arg1: i32) -> (i32, i32, i32) {
    %c0_i32 = arith.constant 0 : i32
    %c0_i32_0 = arith.constant 0 : i32
    return %arg0, %arg1, %c0_i32 : i32, i32, i32
  }
}

</mosaic_0001>

<bundles_post_ra>
// kernel: tpu_custom_call.1
= control target key start
LH: loop header
LB: loop body
LE: loop exit
PB: predicated region body
PF: predicated region fallthrough
CT: control target
= control target key end

     0   :  { %8 = vsyncpa [#allocation3], 0  ;;  %s1767_s0 = inlined_call_operand.hbm [shape: f32[8,16,16], index: 0, kind: input, shape index: {}]   ;;  %s1768_s1 = inlined_call_operand.vmem [shape: f32[32,16], index: 1, kind: input, shape index: {}]   ;;  %s1769_s2 = inlined_call_operand.vmem [shape: f32[16,32], index: 2, kind: input, shape index: {}]   ;;  %s1770_s3 = inlined_call_operand.hbm [shape: f32[8,32,32], index: 3, kind: output, shape index: {}]  }
   0x1   :  { %10 = vsyncpa [#allocation3 + $0x1], 0 }
   0x2   :  { %11 = vsyncpa [#allocation4], 0 }
   0x3   :  { %13 = vsyncpa [#allocation4 + $0x1], 0  ;;  %s1525_s12 = smov 0   ;;  %s1527_s13 = smov 0  }
   0x4   :  { %s1529_s14 = smov 0   ;;  %s1531_s15 = smov 0  }
   0x5   :  { %s1533_s16 = smov 0   ;;  %s1535_s17 = smov 0  }
   0x6 LB: > { %s1123_s18 = sadd.s32 4294967295, %s1497_s17   ;;  %s1124_s19 = sadd.s32 4294967294, %s1497_s17   ;;  %s1497_s17 = sphi %s1535_s17, %s19_s17   ;;  %s1493_s16 = sphi %s1533_s16, %s1781_s16   ;;  %s1489_s15 = sphi %s1531_s15, %s1780_s15   ;;  %s1485_s14 = sphi %s1529_s14, %s1779_s14   ;;  %s1481_s13 = sphi %s1527_s13, %s1778_s13   ;;  %s1477_s12 = sphi %s1525_s12, %s1777_s12  }
   0x7   : > { %s31_s20 = sadd.s32 1, %s1493_s16  ;;  %s38_s21 = sadd.s32 1, %s1485_s14 }
   0x8   : > { %p33_p0 = scmp.ge.s32.totalorder %s31_s20, 2  ;;  %p45_p1 = scmp.ne.s32.totalorder %s1485_s14, %s1481_s13 }
   0x9   : > { %p46_p2 = scmp.eq.s32.totalorder %s1497_s17, 0  ;;  %p51_p3 = scmp.ne.s32.totalorder %s1481_s13, %s1477_s12 }
   0xa   : > { %s1783_s20 = smov (%p33_p0, %s31_s20), 0  ;;  %p52_p5 = scmp.eq.s32.totalorder %s1123_s18, 0 }
   0xb   : > { %p1566_p4 = por %p46_p2, %p45_p1  ;;  %s35_s23 = ssub.s32 %s1493_s16, %s1783_s20 }
   0xc   : > { %p124_p6 = scmp.eq.s32.totalorder %s1123_s18, 1  ;;  %p36_p7 = scmp.eq.s32.totalorder %s35_s23, 0 }
   0xd   : > { %p1572_p8 = por %p52_p5, %p51_p3  ;;  %p130_p10 = scmp.eq.s32.totalorder %s1124_s19, 1 }
   0xe   : > { %p1576_p9 = por %p124_p6, %p45_p1  ;;  %p1335_p13 = scmp.lt.s32.totalorder %s1497_s17, 2 }
   0xf   : > { %s1581_s26 = scalar_select %p36_p7, %s1485_s14, %s38_s21  }
  0x10   : > { %p1583_p11 = por %p130_p10, %p51_p3  ;;  %s162_s28 = sand.u32 1, %s1485_s14  }
  0x11   : > { %s1128_s29 = sshll.u32 %s162_s28, 6  ;;  %s1192_s30 = sshll.u32 %s1493_s16, 10 }
  0x12   : > { %s173_s6 = scalar_lea.hbm %s1767_s0, %s1192_s30  ;;  %s166_s7 = scalar_lea.vmem [#allocation2], %s1128_s29 }
  0x13   : > { %s174_s8 = sshll.u32 %s166_s7, 4  ;;  %p1596_p0 = pnand %p1335_p13, %p1566_p4  ;;  %s175_s8 = int_to_ptr.vmem [resolvable:$true] %s174_s8 }
  0x14   : > { %p1132_p1 = scmp.ge.s32.totalorder %s1497_s17, 1  ;;  %s163_s10 = scalar_lea.sflag [#allocation3], %s162_s28 }
  0x15   : > { %p1391_p2 = pneg %p1596_p0  ;;  %s1402_s11 = scalar_lea.vmem %s175_s8, 1024 }
  0x16   : > { %p1403_p3 = scmp.ne.s32.totalorder %s175_s8, %s1402_s11  ;;  %s1499_s18 = smov [#allocation2]  }
  0x17   : > { %s1407_s19 = sshll.u32 %s1499_s18, 4  ;;  %s1408_s19 = int_to_ptr.vmem [resolvable:$false] %s1407_s19 }
  0x18   : > { %p1405_p5 = pnand %p1403_p3, %p1391_p2  ;;  %s1409_s21 = scalar_lea.vmem %s1408_s19, 2048 }
  0x19   : > { %p1410_p7 = scmp.lt.s32.totalorder %s175_s8, %s1408_s19  ;;  %p1411_p10 = scmp.lt.s32.totalorder %s1409_s21, %s1402_s11 }
  0x1a   : > { %p1406_p6 = pneg %p1405_p5 }
  0x1b   : > { %p1412_p12 = por %p1411_p10, %p1410_p7 }
  0x1d   : > { %p1413_p4 = pnand %p1412_p12, %p1406_p6 }
  0x1f   : > { %1416 = shalt.err (!%p1413_p4)
}
  0x20   : > { %s1500_s22 = smov 128   ;;  %s1501_s23 = smov 8  }
  0x21   : > { %1330 = dma.hbm_to_vmem [thread:$0]  (!%p1596_p0), %s173_s6, 1024, %s175_s8, %s163_s10, %s1500_s22, %s1500_s22, %s1501_s23  }
  0x22   : > { %p182_p13 = scmp.lt.s32.totalorder %s1497_s17, 3 }
  0x24   : > { %p183_p2 = pnand %p1132_p1, %p182_p13 }
  0x25   : > { %s1609_s28 = sand.u32 (!%p183_p2), 1, %s1481_s13  }
  0x26   : > { %186 = sbr.rel (%p183_p2) target bundleno = 482 (0x1e2), region = 32  ;;  %s1133_s29 = sshll.u32 (!%p183_p2), %s1609_s28, 6 }
  0x27   : > { %s189_s30 = scalar_lea.sflag (!%p183_p2), [#allocation3], %s1609_s28  ;;  %s1613_s4 = scalar_lea.vmem (!%p183_p2), [#allocation2], %s1133_s29 }
  0x2b   : > { %1468 = dma.done.wait (%p1572_p8), %s189_s30, 1024  }
  0x2c   : > { %1470 = vsyncadd (%p1572_p8), %s189_s30, 4294966272  ;;  %vm237_vm0 = vcmask 130048   ;;  %v236_v0 = vld [vmem:[%s1613_s4 + $0x8] sm:$0xff]  ;;  %v235_v1 = vld [vmem:[%s1613_s4] sm:$0xff]  ;;  %s1134_s23 = sshll.u32 %s1609_s28, 7  ;;  %vm432_vm1 = vcmask 261120  }
  0x2d   : > { %v229_v2 = vld [vmem:[%s1768_s1] sm:$0xff]  ;;  %1243 = vmatprep.subr.mxu0 %v236_v0  ;;  %v230_v3 = vld [vmem:[%s1768_s1 + $0x8] sm:$0xff]  ;;  %v1144_v4 = vld [vmem:[%s1613_s4 + $0x18] sm:$0xff]  ;;  %s1678_s29 = scalar_lea.vmem [#allocation5], %s1134_s23  ;;  %s1194_s30 = sshll.u32 %s1489_s15, 11 }
  0x2e   : > { %1247 = vmatprep.mubr.msk.f32.mxu0 %vm237_vm0, %v229_v2  ;;  %1244 = vmatpush3.msra.mxu0 %v236_v0  ;;  %v231_v5 = vld [vmem:[%s1768_s1 + $0x10] sm:$0xff]  ;;  %v232_v7 = vld [vmem:[%s1768_s1 + $0x18] sm:$0xff]  ;;  %v1158_v8 = vld [vmem:[%s1613_s4 + $0x28] sm:$0xff]  ;;  %s1713_s7 = scalar_lea.hbm %s1770_s3, %s1194_s30  ;;  %s1008_s15 = scalar_lea.sflag [#allocation4], %s1609_s28 }
  0x2f   : > { %1245 = vmatprep.subr.mxu0 %v235_v1  ;;  %v1143_v6 = vld [vmem:[%s1613_s4 + $0x10] sm:$0xff]  ;;  %v1157_v9 = vld [vmem:[%s1613_s4 + $0x20] sm:$0xff]  ;;  %v1172_v10 = vld [vmem:[%s1613_s4 + $0x38] sm:$0xff]  ;;  %s1502_s24 = smov [#allocation5]  }
  0x30   : > { %1246 = vmatpush3.msra.mxu0 %v235_v1  ;;  %v1171_v11 = vld [vmem:[%s1613_s4 + $0x30] sm:$0xff]  ;;  %v234_v12 = vld [vmem:[%s1769_s2 + $0x8] sm:$0xff]  ;;  %v233_v13 = vld [vmem:[%s1769_s2] sm:$0xff]  ;;  %s1024_s4 = sshll.u32 %s1678_s29, 4  ;;  %s1421_s9 = sshll.u32 %s1502_s24, 4  ;;  %s1715_s4 = int_to_ptr.vmem [resolvable:$true] %s1024_s4  ;;  %s1422_s9 = int_to_ptr.vmem [resolvable:$false] %s1421_s9 }
  0x31   : > { %1248 = vmatmul.mubr.msk.f32.vlgmr.msra.gmra.mxu0 %vm237_vm0, %v230_v3  ;;  %1263 = vmatprep.subr.mxu0 %v1144_v4  ;;  %s1417_s8 = scalar_lea.vmem %s1715_s4, 2048  ;;  %s1423_s10 = scalar_lea.vmem %s1422_s9, 4096 }
  0x32   : > { %1264 = vmatpush3.msra.mxu0 %v1144_v4  ;;  %1250 = vmatprep.mubr.msk.f32.mxu0 %vm237_vm0, %v231_v5  ;;  %p1418_p8 = scmp.ne.s32.totalorder %s1715_s4, %s1417_s8  ;;  %p1424_p1 = scmp.lt.s32.totalorder %s1715_s4, %s1422_s9 }
  0x33   : > { %1265 = vmatprep.subr.mxu0 %v1143_v6  ;;  %1253 = vmatprep.subr.mxu1 %v234_v12  ;;  %p1425_p3 = scmp.lt.s32.totalorder %s1423_s10, %s1417_s8 }
  0x34   : > { %1266 = vmatpush3.msra.mxu0 %v1143_v6  ;;  %1254 = vmatpush3.msra.mxu1 %v234_v12  ;;  %p1419_p12 = pnand %p1418_p8, %p1576_p9 }
  0x35   : > { %1251 = vmatmul.mubr.msk.f32.gmra.mxu0 %vm237_vm0, %v232_v7  ;;  %1283 = vmatprep.subr.mxu0 %v1158_v8  ;;  %p1426_p5 = por %p1425_p3, %p1424_p1 }
  0x36   : > { %1267 = vmatprep.mubr.msk.f32.mxu0 %vm237_vm0, %v229_v2  ;;  %1255 = vmatprep.subr.mxu1 %v233_v13  ;;  %p1420_p0 = pneg %p1419_p12 }
  0x37   : > { %1256 = vmatpush3.msra.mxu1 %v233_v13 }
  0x38   : > { %1273 = vmatprep.subr.mxu1 %v234_v12  ;;  %p1427_p6 = pnand %p1426_p5, %p1420_p0 }
  0x39   : > { %1268 = vmatmul.mubr.msk.f32.vlgmr.msra.gmra.mxu0 %vm237_vm0, %v230_v3 }
  0x3a   : > { %1284 = vmatpush3.msra.mxu0 %v1158_v8  ;;  %1270 = vmatprep.mubr.msk.f32.mxu0 %vm237_vm0, %v231_v5 }
  0x3b   : > { %1285 = vmatprep.subr.mxu0 %v1157_v9 }
  0x3c   : > { %1286 = vmatpush3.msra.mxu0 %v1157_v9 }
  0x3d   : > { %1271 = vmatmul.mubr.msk.f32.gmra.mxu0 %vm237_vm0, %v232_v7  ;;  %1303 = vmatprep.subr.mxu0 %v1172_v10 }
  0x3e   : > { %1287 = vmatprep.mubr.msk.f32.mxu0 %vm237_vm0, %v229_v2 }
  0x41   : > { %1288 = vmatmul.mubr.msk.f32.vlgmr.msra.gmra.mxu0 %vm237_vm0, %v230_v3 }
  0x42   : > { %1304 = vmatpush3.msra.mxu0 %v1172_v10  ;;  %1290 = vmatprep.mubr.msk.f32.mxu0 %vm237_vm0, %v231_v5 }
  0x43   : > { %1305 = vmatprep.subr.mxu0 %v1171_v11 }
  0x44   : > { %1306 = vmatpush3.msra.mxu0 %v1171_v11 }
  0x45   : > { %1291 = vmatmul.mubr.msk.f32.gmra.mxu0 %vm237_vm0, %v232_v7 }
  0x46   : > { %1307 = vmatprep.mubr.msk.f32.mxu0 %vm237_vm0, %v229_v2 }
  0x49   : > { %1308 = vmatmul.mubr.msk.f32.vlgmr.msra.gmra.mxu0 %vm237_vm0, %v230_v3 }
  0x4a   : > { %1310 = vmatprep.mubr.msk.f32.mxu0 %vm237_vm0, %v231_v5 }
  0x4d   : > { %1311 = vmatmul.mubr.msk.f32.gmra.mxu0 %vm237_vm0, %v232_v7 }
  0xf1   : > { %v1249_v14 = vpop.f32.mrf.mxu0 }
  0xf3   : > { %v316_v15 = vpop.f32.mrf.mxu0 }
  0xf4   : > { %1257 = vmatprep.mubr.msk.f32.mxu1 %vm237_vm0, %v316_v15 }
  0xf5   : > { %v1252_v16 = vpop.f32.mrf.mxu0  ;;  %1258 = vmatmul.mubr.msk.f32.vlgmr.msra.gmra.mxu1 %vm237_vm0, %v1249_v14 }
  0xf6   : > { %1274 = vmatpush3.msra.mxu1 %v234_v12 }
  0xf7   : > { %v326_v17 = vpop.f32.mrf.mxu0  ;;  %1275 = vmatprep.subr.mxu1 %v233_v13 }
  0xf8   : > { %1260 = vmatprep.mubr.msk.f32.mxu1 %vm237_vm0, %v326_v17  ;;  %1276 = vmatpush3.msra.mxu1 %v233_v13 }
  0xf9   : > { %1261 = vmatmul.mubr.msk.f32.gmra.mxu1 %vm237_vm0, %v1252_v16  ;;  %v1269_v18 = vpop.f32.mrf.mxu0  ;;  %1293 = vmatprep.subr.mxu1 %v234_v12 }
  0xfb   : > { %v506_v19 = vpop.f32.mrf.mxu0 }
  0xfc   : > { %1277 = vmatprep.mubr.msk.f32.mxu1 %vm237_vm0, %v506_v19 }
  0xfd   : > { %v1272_v20 = vpop.f32.mrf.mxu0  ;;  %1278 = vmatmul.mubr.msk.f32.vlgmr.msra.gmra.mxu1 %vm237_vm0, %v1269_v18 }
  0xfe   : > { %1294 = vmatpush3.msra.mxu1 %v234_v12 }
  0xff   : > { %v516_v21 = vpop.f32.mrf.mxu0  ;;  %1295 = vmatprep.subr.mxu1 %v233_v13 }
 0x100   : > { %1280 = vmatprep.mubr.msk.f32.mxu1 %vm237_vm0, %v516_v21  ;;  %1296 = vmatpush3.msra.mxu1 %v233_v13 }
 0x101   : > { %1281 = vmatmul.mubr.msk.f32.gmra.mxu1 %vm237_vm0, %v1272_v20  ;;  %v1289_v22 = vpop.f32.mrf.mxu0  ;;  %1313 = vmatprep.subr.mxu1 %v234_v12 }
 0x103   : > { %v696_v23 = vpop.f32.mrf.mxu0 }
 0x104   : > { %1297 = vmatprep.mubr.msk.f32.mxu1 %vm237_vm0, %v696_v23 }
 0x105   : > { %v1292_v24 = vpop.f32.mrf.mxu0  ;;  %1298 = vmatmul.mubr.msk.f32.vlgmr.msra.gmra.mxu1 %vm237_vm0, %v1289_v22 }
 0x106   : > { %1314 = vmatpush3.msra.mxu1 %v234_v12 }
 0x107   : > { %v706_v25 = vpop.f32.mrf.mxu0  ;;  %1315 = vmatprep.subr.mxu1 %v233_v13 }
 0x108   : > { %1300 = vmatprep.mubr.msk.f32.mxu1 %vm237_vm0, %v706_v25  ;;  %1316 = vmatpush3.msra.mxu1 %v233_v13 }
 0x109   : > { %1301 = vmatmul.mubr.msk.f32.gmra.mxu1 %vm237_vm0, %v1292_v24  ;;  %v1309_v26 = vpop.f32.mrf.mxu0 }
 0x10b   : > { %v886_v27 = vpop.f32.mrf.mxu0 }
 0x10c   : > { %1317 = vmatprep.mubr.msk.f32.mxu1 %vm237_vm0, %v886_v27 }
 0x10d   : > { %v1312_v28 = vpop.f32.mrf.mxu0  ;;  %1318 = vmatmul.mubr.msk.f32.vlgmr.msra.gmra.mxu1 %vm237_vm0, %v1309_v26 }
 0x10f   : > { %v896_v29 = vpop.f32.mrf.mxu0 }
 0x110   : > { %1320 = vmatprep.mubr.msk.f32.mxu1 %vm237_vm0, %v896_v29 }
 0x111   : > { %1321 = vmatmul.mubr.msk.f32.gmra.mxu1 %vm237_vm0, %v1312_v28 }
 0x1b5   : > { %v1259_v30 = vpop.f32.mrf.mxu1 }
 0x1b6   : > { %434 = vst.msk [vmem:[%s1678_s29 + $0x8] sm:$0xff] %vm432_vm1, %v1259_v30 }
 0x1b7   : > { %v413_v31 = vpop.f32.mrf.mxu1 }
 0x1b8   : > { %433 = vst.msk [vmem:[%s1678_s29] sm:$0xff] %vm432_vm1, %v413_v31 }
 0x1b9   : > { %v1262_v32 = vpop.f32.mrf.mxu1 }
 0x1ba   : > { %436 = vst.msk [vmem:[%s1678_s29 + $0x18] sm:$0xff] %vm432_vm1, %v1262_v32 }
 0x1bb   : > { %v423_v33 = vpop.f32.mrf.mxu1 }
 0x1bc   : > { %435 = vst.msk [vmem:[%s1678_s29 + $0x10] sm:$0xff] %vm432_vm1, %v423_v33 }
 0x1bd   : > { %v1279_v34 = vpop.f32.mrf.mxu1 }
 0x1be   : > { %1154 = vst.msk [vmem:[%s1678_s29 + $0x28] sm:$0xff] %vm432_vm1, %v1279_v34 }
 0x1bf   : > { %v603_v35 = vpop.f32.mrf.mxu1 }
 0x1c0   : > { %1153 = vst.msk [vmem:[%s1678_s29 + $0x20] sm:$0xff] %vm432_vm1, %v603_v35 }
 0x1c1   : > { %v1282_v36 = vpop.f32.mrf.mxu1 }
 0x1c2   : > { %1156 = vst.msk [vmem:[%s1678_s29 + $0x38] sm:$0xff] %vm432_vm1, %v1282_v36 }
 0x1c3   : > { %v613_v37 = vpop.f32.mrf.mxu1 }
 0x1c4   : > { %1155 = vst.msk [vmem:[%s1678_s29 + $0x30] sm:$0xff] %vm432_vm1, %v613_v37 }
 0x1c5   : > { %v1299_v38 = vpop.f32.mrf.mxu1 }
 0x1c6   : > { %1168 = vst.msk [vmem:[%s1678_s29 + $0x48] sm:$0xff] %vm432_vm1, %v1299_v38 }
 0x1c7   : > { %v793_v39 = vpop.f32.mrf.mxu1 }
 0x1c8   : > { %1167 = vst.msk [vmem:[%s1678_s29 + $0x40] sm:$0xff] %vm432_vm1, %v793_v39 }
 0x1c9   : > { %v1302_v40 = vpop.f32.mrf.mxu1 }
 0x1ca   : > { %1170 = vst.msk [vmem:[%s1678_s29 + $0x58] sm:$0xff] %vm432_vm1, %v1302_v40 }
 0x1cb   : > { %v803_v41 = vpop.f32.mrf.mxu1 }
 0x1cc   : > { %1169 = vst.msk [vmem:[%s1678_s29 + $0x50] sm:$0xff] %vm432_vm1, %v803_v41 }
 0x1cd   : > { %v1319_v42 = vpop.f32.mrf.mxu1 }
 0x1ce   : > { %1182 = vst.msk [vmem:[%s1678_s29 + $0x68] sm:$0xff] %vm432_vm1, %v1319_v42 }
 0x1cf   : > { %v983_v43 = vpop.f32.mrf.mxu1 }
 0x1d0   : > { %1181 = vst.msk [vmem:[%s1678_s29 + $0x60] sm:$0xff] %vm432_vm1, %v983_v43 }
 0x1d1   : > { %v1322_v44 = vpop.f32.mrf.mxu1 }
 0x1d2   : > { %1184 = vst.msk [vmem:[%s1678_s29 + $0x78] sm:$0xff] %vm432_vm1, %v1322_v44 }
 0x1d3   : > { %v993_v45 = vpop.f32.mrf.mxu1 }
 0x1d4   : > { %1183 = vst.msk [vmem:[%s1678_s29 + $0x70] sm:$0xff] %vm432_vm1, %v993_v45 }
 0x1d5   : > { %1430 = shalt.err (!%p1427_p6)
}
 0x1d6   : > { %s1431_s11 = scalar_lea.hbm %s1713_s7, 2048  ;;  %s1435_s21 = scalar_lea.hbm %s1770_s3, 4096 }
 0x1d7   : > { %p1432_p7 = scmp.ne.s32.totalorder %s1713_s7, %s1431_s11  ;;  %p1436_p13 = scmp.lt.s32.totalorder %s1713_s7, %s1770_s3 }
 0x1d8   : > { %p1437_p2 = scmp.lt.s32.totalorder %s1435_s21, %s1431_s11 }
 0x1d9   : > { %p1433_p10 = pnand %p1432_p7, %p1576_p9 }
 0x1da   : > { %p1438_p8 = por %p1437_p2, %p1436_p13 }
 0x1db   : > { %p1434_p4 = pneg %p1433_p10 }
 0x1dd   : > { %p1439_p12 = pnand %p1438_p8, %p1434_p4 }
 0x1df   : > { %1442 = shalt.err (!%p1439_p12)
}
 0x1e0   : > { %s1503_s29 = smov 128   ;;  %s1504_s30 = smov 8  }
 0x1e1   : > { %1325 = dma.vmem_to_hbm [thread:$0]  (%p1576_p9), %s1715_s4, 2048, %s1713_s7, %s1008_s15, %s1503_s29, %s1503_s29, %s1504_s30  }
 0x1e2 PF: > { %s1039_s5 = sand.u32 1, %s1477_s12   ;;  %p1776_p0 = scmp.ge.s32.totalorder %s1497_s17, 2 }
 0x1e3   : > { %s1040_s6 = scalar_lea.sflag [#allocation4], %s1039_s5 }
 0x1e4   : > { %p1332_p1 = pnand %p1776_p0, %p1583_p11 }
 0x1e6   : > { %p1333_p3 = pneg %p1332_p1 }
 0x1e8   : > { %1472 = dma.done.wait (%p1333_p3), %s1040_s6, 2048  }
 0x1e9   : > { %1474 = vsyncadd (%p1333_p3), %s1040_s6, 4294965248  ;;  %s19_s17 = sadd.s32 1, %s1497_s17   ;;  %s1777_s12 = smov %s1481_s13 }
 0x1ea   : > { %p16_p5 = scmp.ge.s32.totalorder %s19_s17, 4   ;;  %s1778_s13 = smov %s1485_s14 }
 0x1eb   : > { %s1779_s14 = smov %s1581_s26  ;;  %s1780_s15 = smov %s1493_s16 }
 0x1ec   : > { %s1781_s16 = smov %s1783_s20  ;;  %18 = sbr.rel (!%p16_p5) target bundleno = 6 (0x6), region = 86 }
 0x1f1   :  { %1045 = vsyncpa [#allocation3], 1 }
 0x1f2   :  { %1047 = vsyncpa [#allocation3 + $0x1], 1 }
 0x1f3   :  { %1048 = vsyncpa [#allocation4], 1 }
 0x1f4   :  { %1050 = vsyncpa [#allocation4 + $0x1], 1 }

</bundles_post_ra>
